<compile_context>
chip_gen: v7x
topology: tpu7x:2x2x1
jax: 0.10.0
libtpu: 0.0.40
codegen_flags: <defaults>
</compile_context>

<pallas_src>
import jax
import jax.numpy as jnp
from jax.experimental import pallas as pl
from jax.experimental.pallas import tpu as pltpu


def _lane_dense_2d(b: int, channels: int) -> tuple[int, int]:
    """Pick a lane-dense 2-D view (rows, cols) of the contiguous B*channels
    payload with cols a multiple of 128 whenever the total allows it."""
    if channels % 128 == 0:
        return b, channels
    total = b * channels
    for cols in (8192, 4096, 2048, 1024, 512, 256, 128):
        if total % cols == 0:
            return total // cols, cols
    # Fall back to the natural shape (still correct; DMA rows are just narrow).
    return b, channels


def _make_dma_copy_kernel(row_starts: tuple[int, ...], row_sizes: tuple[int, ...]):
    """Kernel that copies a 2-D HBM array to another HBM array via direct
    HBM->HBM DMA, with all row-chunks started before any wait (in-flight
    overlap across the DMA engines)."""
    n_chunks = len(row_starts)

    def kernel(x_hbm, o_hbm, sems):
        copies = []
        for i in range(n_chunks):  # static Python unroll: chunk bounds are static
            s, sz = row_starts[i], row_sizes[i]
            cp = pltpu.make_async_copy(
                x_hbm.at[pl.ds(s, sz), :],
                o_hbm.at[pl.ds(s, sz), :],
                sems.at[i],
            )
            cp.start()
            copies.append(cp)
        for cp in copies:
            cp.wait()

    return kernel


def vectorize_pallas(x: jax.Array, channels: int) -> jax.Array:
    """Pallas implementation of Vectorize(channels).forward(x).

    Direct HBM->HBM DMA copy of the flattened (B, channels) payload (viewed as
    a lane-dense slab), with up to 4 chunks in flight.  No VMEM staging, no
    vector load/store slots consumed.  Use only when the flatten must be
    materialized by a kernel (e.g. staged for fusion with a consumer);
    otherwise prefer `vectorize` below.
    """
    b = x.shape[0]
    total = b * channels
    itemsize = jnp.dtype(x.dtype).itemsize

    # Layout glue: row-major flatten (identical to torch.reshape on contiguous
    # NCHW), then re-view as a lane-dense 2-D slab.  Both are metadata ops on a
    # contiguous array.
    rows, cols = _lane_dense_2d(b, channels)
    x2 = x.reshape(rows, cols)

    # Up to 4 DMA chunks in flight, split along rows (static bounds).
    n_chunks = max(1, min(4, rows))
    base, rem = divmod(rows, n_chunks)
    row_sizes = tuple(base + (1 if i < rem else 0) for i in range(n_chunks))
    row_starts = []
    acc = 0
    for sz in row_sizes:
        row_starts.append(acc)
        acc += sz
    row_starts = tuple(row_starts)

    kernel = _make_dma_copy_kernel(row_starts, row_sizes)

    out = pl.pallas_call(
        kernel,
        out_shape=jax.ShapeDtypeStruct((rows, cols), x.dtype),
        in_specs=[pl.BlockSpec(memory_space=pl.ANY)],   # raw HBM ref, no auto-DMA
        out_specs=pl.BlockSpec(memory_space=pl.ANY),    # raw HBM ref, no auto-DMA
        scratch_shapes=[pltpu.SemaphoreType.DMA((n_chunks,))],
        cost_estimate=pl.CostEstimate(
            flops=0,
            transcendentals=0,
            bytes_accessed=2 * total * itemsize,
        ),
    )(x2)
    return out.reshape(b, channels)


def vectorize(x: jax.Array, channels: int) -> jax.Array:
    """Recommended production path: the flatten is a pure metadata operation.

    Matches torch.reshape(x.shape[0], channels) on contiguous NCHW exactly and
    costs zero HBM traffic / zero kernel-launch overhead.
    """
    return x.reshape(x.shape[0], channels)


if __name__ == "__main__":
    # Small shapes consistent with the module: batch=2, C=4, H=W=16
    # => channels = C*H*W = 1024.
    key = jax.random.PRNGKey(0)
    B, C, H, W = 2, 4, 16, 16
    channels = C * H * W

    x = jax.random.normal(key, (B, C, H, W), dtype=jnp.float32)
    ref = x.reshape(B, channels)

    # Zero-cost production path.
    y_fast = jax.block_until_ready(vectorize(x, channels))
    assert y_fast.shape == (B, channels) and y_fast.dtype == x.dtype
    assert jnp.array_equal(y_fast, ref), "reshape fast-path mismatch"

    # Pallas HBM->HBM DMA path (kept for fusion scenarios) — must also run clean.
    y_pallas = jax.block_until_ready(vectorize_pallas(x, channels))
    assert y_pallas.shape == (B, channels) and y_pallas.dtype == x.dtype
    assert jnp.array_equal(y_pallas, ref), "Pallas Vectorize mismatch vs reference"

    print("KERNEL_OK")
</pallas_src>

<mosaic_0001>
module attributes {stable_mosaic.version = 11 : i64} {
  func.func @kernel(%arg0: memref<2x1024xf32, #tpu.memory_space<any>>, %arg1: memref<2x1024xf32, #tpu.memory_space<any>>, %arg2: memref<2x!tpu.dma_semaphore, #tpu.memory_space<semaphore_mem>>) attributes {dimension_semantics = [], scalar_prefetch = 0 : i64, scratch_operands = 1 : i64, tpu.core_type = #tpu.core_type<tc>} {
    %c0_i32 = arith.constant 0 : i32
    %c0_i32_0 = arith.constant 0 : i32
    %c0_i32_1 = arith.constant 0 : i32
    %0 = tpu.memref_slice %arg0[%c0_i32_0, %c0_i32_1] : memref<2x1024xf32, #tpu.memory_space<any>> -> memref<1x1024xf32, #tpu.memory_space<any>>
    %c0_i32_2 = arith.constant 0 : i32
    %c0_i32_3 = arith.constant 0 : i32
    %1 = tpu.memref_slice %arg1[%c0_i32_2, %c0_i32_3] : memref<2x1024xf32, #tpu.memory_space<any>> -> memref<1x1024xf32, #tpu.memory_space<any>>
    %2 = tpu.memref_slice %arg2[%c0_i32] : memref<2x!tpu.dma_semaphore, #tpu.memory_space<semaphore_mem>> -> memref<1x!tpu.dma_semaphore, #tpu.memory_space<semaphore_mem>>
    %3 = tpu.memref_squeeze %2 : memref<1x!tpu.dma_semaphore, #tpu.memory_space<semaphore_mem>> -> memref<!tpu.dma_semaphore, #tpu.memory_space<semaphore_mem>>
    tpu.enqueue_dma source(%0 : memref<1x1024xf32, #tpu.memory_space<any>>) target(%1 : memref<1x1024xf32, #tpu.memory_space<any>>) target_semaphore(%3 : memref<!tpu.dma_semaphore, #tpu.memory_space<semaphore_mem>>)
    %c1_i32 = arith.constant 1 : i32
    %c1_i32_4 = arith.constant 1 : i32
    %c0_i32_5 = arith.constant 0 : i32
    %4 = tpu.memref_slice %arg0[%c1_i32_4, %c0_i32_5] : memref<2x1024xf32, #tpu.memory_space<any>> -> memref<1x1024xf32, #tpu.memory_space<any>>
    %c1_i32_6 = arith.constant 1 : i32
    %c0_i32_7 = arith.constant 0 : i32
    %5 = tpu.memref_slice %arg1[%c1_i32_6, %c0_i32_7] : memref<2x1024xf32, #tpu.memory_space<any>> -> memref<1x1024xf32, #tpu.memory_space<any>>
    %6 = tpu.memref_slice %arg2[%c1_i32] : memref<2x!tpu.dma_semaphore, #tpu.memory_space<semaphore_mem>> -> memref<1x!tpu.dma_semaphore, #tpu.memory_space<semaphore_mem>>
    %7 = tpu.memref_squeeze %6 : memref<1x!tpu.dma_semaphore, #tpu.memory_space<semaphore_mem>> -> memref<!tpu.dma_semaphore, #tpu.memory_space<semaphore_mem>>
    tpu.enqueue_dma source(%4 : memref<1x1024xf32, #tpu.memory_space<any>>) target(%5 : memref<1x1024xf32, #tpu.memory_space<any>>) target_semaphore(%7 : memref<!tpu.dma_semaphore, #tpu.memory_space<semaphore_mem>>)
    %c0_i32_8 = arith.constant 0 : i32
    %c0_i32_9 = arith.constant 0 : i32
    %c0_i32_10 = arith.constant 0 : i32
    %8 = tpu.memref_slice %arg0[%c0_i32_9, %c0_i32_10] : memref<2x1024xf32, #tpu.memory_space<any>> -> memref<1x1024xf32, #tpu.memory_space<any>>
    %c0_i32_11 = arith.constant 0 : i32
    %c0_i32_12 = arith.constant 0 : i32
    %9 = tpu.memref_slice %arg1[%c0_i32_11, %c0_i32_12] : memref<2x1024xf32, #tpu.memory_space<any>> -> memref<1x1024xf32, #tpu.memory_space<any>>
    %10 = tpu.memref_slice %arg2[%c0_i32_8] : memref<2x!tpu.dma_semaphore, #tpu.memory_space<semaphore_mem>> -> memref<1x!tpu.dma_semaphore, #tpu.memory_space<semaphore_mem>>
    %11 = tpu.memref_squeeze %10 : memref<1x!tpu.dma_semaphore, #tpu.memory_space<semaphore_mem>> -> memref<!tpu.dma_semaphore, #tpu.memory_space<semaphore_mem>>
    tpu.wait_dma2 semaphore(%11 : memref<!tpu.dma_semaphore, #tpu.memory_space<semaphore_mem>>) src(%8 : memref<1x1024xf32, #tpu.memory_space<any>>) dst(%9 : memref<1x1024xf32, #tpu.memory_space<any>>)
    %c1_i32_13 = arith.constant 1 : i32
    %c1_i32_14 = arith.constant 1 : i32
    %c0_i32_15 = arith.constant 0 : i32
    %12 = tpu.memref_slice %arg0[%c1_i32_14, %c0_i32_15] : memref<2x1024xf32, #tpu.memory_space<any>> -> memref<1x1024xf32, #tpu.memory_space<any>>
    %c1_i32_16 = arith.constant 1 : i32
    %c0_i32_17 = arith.constant 0 : i32
    %13 = tpu.memref_slice %arg1[%c1_i32_16, %c0_i32_17] : memref<2x1024xf32, #tpu.memory_space<any>> -> memref<1x1024xf32, #tpu.memory_space<any>>
    %14 = tpu.memref_slice %arg2[%c1_i32_13] : memref<2x!tpu.dma_semaphore, #tpu.memory_space<semaphore_mem>> -> memref<1x!tpu.dma_semaphore, #tpu.memory_space<semaphore_mem>>
    %15 = tpu.memref_squeeze %14 : memref<1x!tpu.dma_semaphore, #tpu.memory_space<semaphore_mem>> -> memref<!tpu.dma_semaphore, #tpu.memory_space<semaphore_mem>>
    tpu.wait_dma2 semaphore(%15 : memref<!tpu.dma_semaphore, #tpu.memory_space<semaphore_mem>>) src(%12 : memref<1x1024xf32, #tpu.memory_space<any>>) dst(%13 : memref<1x1024xf32, #tpu.memory_space<any>>)
    return
  }
}

</mosaic_0001>

<bundles_post_ra>
// kernel: tpu_custom_call.1
= control target key start
LH: loop header
LB: loop body
LE: loop exit
PB: predicated region body
PF: predicated region fallthrough
CT: control target
= control target key end

     0   :  { %s78_s6 = smov 32   ;;  %s79_s7 = smov 1   ;;  %s107_s0 = inlined_call_operand.hbm [shape: f32[2,1024], index: 0, kind: input, shape index: {}]   ;;  %s108_s1 = inlined_call_operand.hbm [shape: f32[2,1024], index: 1, kind: output, shape index: {}]  }
   0x1   :  { %18 = sst [smem:[#allocation4]] %s78_s6  ;;  %s80_s8 = smov [#allocation2]  }
   0x2   :  { %20 = sst [smem:[#allocation4 + $0x1]] %s78_s6  ;;  %s81_s9 = smov [#allocation3]  }
   0x3   :  { %22 = sst [smem:[#allocation4 + $0x2]] %s79_s7  ;;  %s82_s10 = smov 0  }
   0x4   :  { %24 = dma.general %s107_s0, 128, %s108_s1, %s80_s8, %s81_s9, [#allocation4], %s82_s10, 0  }
   0x5   :  { %40 = sst [smem:[#allocation6]] %s78_s6  ;;  %s25_s17 = scalar_lea.hbm %s107_s0, 16 }
   0x6   :  { %42 = sst [smem:[#allocation6 + $0x1]] %s78_s6  ;;  %s26_s20 = scalar_lea.hbm %s108_s1, 16 }
   0x7   :  { %44 = sst [smem:[#allocation6 + $0x2]] %s79_s7  ;;  %s83_s21 = smov [#allocation2 + $0x1]  }
   0x8   :  { %s84_s22 = smov [#allocation5]  }
   0x9   :  { %46 = dma.general %s25_s17, 128, %s26_s20, %s83_s21, %s84_s22, [#allocation6], %s82_s10, 0  }
   0xa   :  { %74 = dma.done.wait [#allocation2], 128 }
   0xb   :  { %75 = vsyncadd [#allocation2], 4294967168 }
   0xc   :  { %76 = dma.done.wait [#allocation2 + $0x1], 128 }
   0xd   :  { %77 = vsyncadd [#allocation2 + $0x1], 4294967168 }
   0xe   :  { %52 = vsyncmov [#allocation2] }
  0x11   :  { %s53_s23 = vpop.sfrf %52 }
  0x12   :  { %p65_p0 = scmp.ne.s32.totalorder %s53_s23, 0 }
  0x14   :  { %57 = shalt.err (%p65_p0)  }
  0x15   :  { %59 = vsyncmov [#allocation2 + $0x1] }
  0x18   :  { %s60_s24 = vpop.sfrf %59 }
  0x19   :  { %p66_p1 = scmp.ne.s32.totalorder %s60_s24, 0 }
  0x1b   :  { %64 = shalt.err (%p66_p1)  }

</bundles_post_ra>
